<compile_context>
chip_gen: v7x
topology: tpu7x:2x2x1
jax: 0.10.0
libtpu: 0.0.40
codegen_flags: <defaults>
</compile_context>

<pallas_src>
import functools

import jax
import jax.numpy as jnp
from jax.experimental import pallas as pl
from jax.experimental.pallas import tpu as pltpu


def _round_up(x, m):
    return (x + m - 1) // m * m


def _attention_math(src_ref, tgt_ref, w1_ref, b1_ref, w2t_ref, w2s_ref, b2_ref,
                    *, mxu_dtype, approx_recip, vpu_source_fma):
    tgt = tgt_ref[...]
    tgt_f32 = tgt.astype(jnp.float32)

    # source_transform_layer: Linear + ReLU (args.activation assumed ReLU).
    emb = jnp.dot(src_ref[...].astype(mxu_dtype), w1_ref[...],
                  preferred_element_type=jnp.float32) + b1_ref[...]
    emb = jnp.maximum(emb, 0.0)

    # attention head: Linear on cat([target, emb]) expressed without the concat.
    logits = jnp.dot(tgt.astype(mxu_dtype), w2t_ref[...],
                     preferred_element_type=jnp.float32) + b2_ref[...]
    if vpu_source_fma:
        # K = D is tiny: D broadcast multiply-adds on the VPU instead of an MXU contraction.
        w2s = w2s_ref[...]
        for d in range(w2s.shape[0]):
            logits = logits + emb[:, d:d + 1] * w2s[d:d + 1, :]
    else:
        logits = logits + jnp.dot(emb.astype(mxu_dtype), w2s_ref[...],
                                  preferred_element_type=jnp.float32)
    logits = jnp.tanh(logits)

    # softmax over target_len lanes. tanh bounds logits to [-1, 1], so exp() cannot
    # overflow -> no max-subtraction (saves a cross-lane XLU reduce).
    e = jnp.exp(logits)
    denom = jnp.sum(e, axis=-1, keepdims=True)
    attn = e * pl.reciprocal(denom, approx=approx_recip)

    out = attn * tgt_f32
    return out, attn


def _kernel_with_attn(src_ref, tgt_ref, w1_ref, b1_ref, w2t_ref, w2s_ref, b2_ref,
                      out_ref, attn_ref, **kw):
    out, attn = _attention_math(src_ref, tgt_ref, w1_ref, b1_ref, w2t_ref, w2s_ref,
                                b2_ref, **kw)
    out_ref[...] = out.astype(out_ref.dtype)
    attn_ref[...] = attn.astype(attn_ref.dtype)


def _kernel_no_attn(src_ref, tgt_ref, w1_ref, b1_ref, w2t_ref, w2s_ref, b2_ref,
                    out_ref, **kw):
    out, _ = _attention_math(src_ref, tgt_ref, w1_ref, b1_ref, w2t_ref, w2s_ref,
                             b2_ref, **kw)
    out_ref[...] = out.astype(out_ref.dtype)


def mlp_attention(source, target, w1, b1, w2, b2, *,
                  get_attention_score=True, block_rows=2048,
                  mxu_dtype=jnp.bfloat16, approx_recip=True):
    """source: [B, S], target: [B, T], w1: [S, D], b1: [D], w2: [T+D, T], b2: [T]."""
    B, S = source.shape
    Bt, T = target.shape
    D = w1.shape[1]
    assert Bt == B and w2.shape == (T + D, T)

    # Batch tile: big enough to amortize per-step overhead, no larger than the batch,
    # and capped so the parallel grid keeps >= ~4 steps (v7x megacore has 2 TCs).
    bb_req = _round_up(max(block_rows, 8), 8)
    bb_cap_batch = _round_up(B, 8)
    bb_cap_cores = max(8, _round_up(pl.cdiv(B, 4), 8))
    bb = min(bb_req, bb_cap_batch, bb_cap_cores)
    grid = (pl.cdiv(B, bb),)          # trailing partial tile handled by Pallas (OOB
                                      # reads are garbage rows, OOB writes are dropped)

    # Split the concat-weight into target / source-embedding parts (no lane padding).
    vpu_source_fma = D <= 8
    w1_c = w1.astype(mxu_dtype)                                       # [S, D]
    w2_t = w2[:T, :].astype(mxu_dtype)                                # [T, T]
    w2_s = w2[T:, :].astype(jnp.float32 if vpu_source_fma else mxu_dtype)  # [D, T]
    b1_2d = b1.reshape(1, D).astype(jnp.float32)
    b2_2d = b2.reshape(1, T).astype(jnp.float32)

    tile = lambda shape: pl.BlockSpec(shape, lambda i: (i, 0))        # batch-tiled
    resident = lambda shape: pl.BlockSpec(shape, lambda i: (0, 0))    # VMEM-resident weights

    in_specs = [tile((bb, S)), tile((bb, T)),
                resident((S, D)), resident((1, D)),
                resident((T, T)), resident((D, T)), resident((1, T))]

    common = dict(mxu_dtype=mxu_dtype, approx_recip=approx_recip,
                  vpu_source_fma=vpu_source_fma)
    if get_attention_score:
        kernel = functools.partial(_kernel_with_attn, **common)
        out_shape = (jax.ShapeDtypeStruct((B, T), target.dtype),
                     jax.ShapeDtypeStruct((B, T), target.dtype))   # attn in target dtype
        out_specs = (tile((bb, T)), tile((bb, T)))
    else:
        kernel = functools.partial(_kernel_no_attn, **common)
        out_shape = jax.ShapeDtypeStruct((B, T), target.dtype)
        out_specs = tile((bb, T))

    result = pl.pallas_call(
        kernel,
        out_shape=out_shape,
        grid_spec=pltpu.PrefetchScalarGridSpec(
            num_scalar_prefetch=0,
            grid=grid,
            in_specs=in_specs,
            out_specs=out_specs,
        ),
        compiler_params=pltpu.CompilerParams(
            dimension_semantics=("parallel",),          # batch tiles shardable across TCs
            vmem_limit_bytes=32 * 1024 * 1024,          # safe even on v7x (64 MiB physical)
        ),
    )(source, target, w1_c, b1_2d, w2_t, w2_s, b2_2d)

    if get_attention_score:
        out, attn = result
        return out, attn
    return result, None


def reference(source, target, w1, b1, w2, b2):
    emb = jnp.maximum(source @ w1 + b1, 0.0)
    concat = jnp.concatenate([target, emb], axis=1)
    attn = jax.nn.softmax(jnp.tanh(concat @ w2 + b2), axis=-1)
    return attn * target, attn


if __name__ == "__main__":
    # module hyper-params (small, consistent with __init__):
    source_len = 16
    target_len = 32
    source_attn_ratio = 16
    source_transform_dim = target_len // source_attn_ratio + 1   # = 3
    concat_dim = target_len + source_transform_dim               # = 35
    batch = 8

    key = jax.random.PRNGKey(0)
    k_src, k_tgt, k_w1, k_b1, k_w2, k_b2, k_src2, k_tgt2 = jax.random.split(key, 8)

    source = jax.random.normal(k_src, (batch, source_len), dtype=jnp.float32)
    target = jax.random.normal(k_tgt, (batch, target_len), dtype=jnp.float32)

    # deterministic synthetic parameters (NormLinear ~ Linear: weight [in, out] + bias)
    w1 = jax.random.normal(k_w1, (source_len, source_transform_dim), jnp.float32) * 0.1
    b1 = jax.random.normal(k_b1, (source_transform_dim,), jnp.float32) * 0.1
    w2 = jax.random.normal(k_w2, (concat_dim, target_len), jnp.float32) * 0.1
    b2 = jax.random.normal(k_b2, (target_len,), jnp.float32) * 0.1

    ref_out, ref_attn = reference(source, target, w1, b1, w2, b2)

    # 1) default fast path: bf16 MXU operands (f32 acc) + approx EUP reciprocal.
    out, attn = jax.block_until_ready(
        mlp_attention(source, target, w1, b1, w2, b2, get_attention_score=True))
    assert out.shape == (batch, target_len) and attn.shape == (batch, target_len)
    assert jnp.allclose(out, ref_out, atol=5e-3, rtol=5e-3)
    assert jnp.allclose(attn, ref_attn, atol=5e-3, rtol=5e-3)
    assert jnp.allclose(jnp.sum(attn, axis=-1), 1.0, atol=5e-3)

    # 2) full-precision path (f32 MXU operands, exact reciprocal) -> tight tolerance.
    out_fp, attn_fp = jax.block_until_ready(
        mlp_attention(source, target, w1, b1, w2, b2, get_attention_score=True,
                      mxu_dtype=jnp.float32, approx_recip=False))
    assert jnp.allclose(out_fp, ref_out, atol=1e-4, rtol=1e-4)
    assert jnp.allclose(attn_fp, ref_attn, atol=1e-4, rtol=1e-4)

    # 3) attention-free path (halves output writeback when the caller discards attn).
    out2, none_attn = jax.block_until_ready(
        mlp_attention(source, target, w1, b1, w2, b2, get_attention_score=False))
    assert none_attn is None
    assert jnp.allclose(out2, ref_out, atol=5e-3, rtol=5e-3)

    # 4) ragged batch (B=13): trailing partial batch tile handled in-kernel by the grid,
    #    no wrapper pad / slice; small block_rows forces a multi-step grid.
    b2_batch = 13
    source_r = jax.random.normal(k_src2, (b2_batch, source_len), dtype=jnp.float32)
    target_r = jax.random.normal(k_tgt2, (b2_batch, target_len), dtype=jnp.float32)
    ref_out_r, ref_attn_r = reference(source_r, target_r, w1, b1, w2, b2)
    out_r, attn_r = jax.block_until_ready(
        mlp_attention(source_r, target_r, w1, b1, w2, b2, get_attention_score=True,
                      block_rows=8, mxu_dtype=jnp.float32, approx_recip=False))
    assert out_r.shape == (b2_batch, target_len)
    assert jnp.allclose(out_r, ref_out_r, atol=1e-4, rtol=1e-4)
    assert jnp.allclose(attn_r, ref_attn_r, atol=1e-4, rtol=1e-4)

    print("KERNEL_OK")
</pallas_src>

<mosaic_0001>
module attributes {stable_mosaic.version = 11 : i64} {
  func.func @_kernel_with_attn(%arg0: i32, %arg1: memref<8x16xf32, #tpu.memory_space<vmem>>, %arg2: memref<8x32xf32, #tpu.memory_space<vmem>>, %arg3: memref<16x3xbf16, #tpu.memory_space<vmem>>, %arg4: memref<1x3xf32, #tpu.memory_space<vmem>>, %arg5: memref<32x32xbf16, #tpu.memory_space<vmem>>, %arg6: memref<3x32xf32, #tpu.memory_space<vmem>>, %arg7: memref<1x32xf32, #tpu.memory_space<vmem>>, %arg8: memref<8x32xf32, #tpu.memory_space<vmem>>, %arg9: memref<8x32xf32, #tpu.memory_space<vmem>>) attributes {dimension_semantics = [#tpu.dimension_semantics<parallel>], iteration_bounds = array<i64: 1>, scalar_prefetch = 0 : i64, scratch_operands = 0 : i64, tpu.core_type = #tpu.core_type<tc>, window_params = [{transform_indices = @transform_0, window_bounds = array<i64: 8, 16>}, {transform_indices = @transform_1, window_bounds = array<i64: 8, 32>}, {pipeline_mode = #tpu.pipeline_mode<synchronous>, transform_indices = @transform_2, window_bounds = array<i64: 16, 3>}, {pipeline_mode = #tpu.pipeline_mode<synchronous>, transform_indices = @transform_3, window_bounds = array<i64: 1, 3>}, {pipeline_mode = #tpu.pipeline_mode<synchronous>, transform_indices = @transform_4, window_bounds = array<i64: 32, 32>}, {pipeline_mode = #tpu.pipeline_mode<synchronous>, transform_indices = @transform_5, window_bounds = array<i64: 3, 32>}, {pipeline_mode = #tpu.pipeline_mode<synchronous>, transform_indices = @transform_6, window_bounds = array<i64: 1, 32>}, {transform_indices = @transform_7, window_bounds = array<i64: 8, 32>}, {transform_indices = @transform_8, window_bounds = array<i64: 8, 32>}]} {
    %c0 = arith.constant 0 : index
    %c0_0 = arith.constant 0 : index
    %0 = vector.load %arg2[%c0, %c0_0] : memref<8x32xf32, #tpu.memory_space<vmem>>, vector<8x32xf32>
    %c0_1 = arith.constant 0 : index
    %c0_2 = arith.constant 0 : index
    %1 = vector.load %arg1[%c0_1, %c0_2] : memref<8x16xf32, #tpu.memory_space<vmem>>, vector<8x16xf32>
    %2 = arith.truncf %1 : vector<8x16xf32> to vector<8x16xbf16>
    %c0_3 = arith.constant 0 : index
    %c0_4 = arith.constant 0 : index
    %3 = vector.load %arg3[%c0_3, %c0_4] : memref<16x3xbf16, #tpu.memory_space<vmem>>, vector<16x3xbf16>
    %cst = arith.constant dense<0.000000e+00> : vector<8x3xf32>
    %4 = tpu.matmul %2, %3, %cst {dimension_numbers = #tpu.dot_dimension_numbers<[1], [0], [0], [1], [0, 0, 1, 1], [], []>} : vector<8x16xbf16>, vector<16x3xbf16>, vector<8x3xf32> -> vector<8x3xf32>
    %c0_5 = arith.constant 0 : index
    %c0_6 = arith.constant 0 : index
    %5 = vector.load %arg4[%c0_5, %c0_6] : memref<1x3xf32, #tpu.memory_space<vmem>>, vector<1x3xf32>
    %6 = vector.broadcast %5 : vector<1x3xf32> to vector<8x3xf32>
    %7 = arith.addf %4, %6 : vector<8x3xf32>
    %cst_7 = arith.constant 0.000000e+00 : f32
    %8 = vector.broadcast %cst_7 : f32 to vector<8x3xf32>
    %9 = arith.maximumf %7, %8 : vector<8x3xf32>
    %10 = arith.truncf %0 : vector<8x32xf32> to vector<8x32xbf16>
    %c0_8 = arith.constant 0 : index
    %c0_9 = arith.constant 0 : index
    %11 = vector.load %arg5[%c0_8, %c0_9] : memref<32x32xbf16, #tpu.memory_space<vmem>>, vector<32x32xbf16>
    %cst_10 = arith.constant dense<0.000000e+00> : vector<8x32xf32>
    %12 = tpu.matmul %10, %11, %cst_10 {dimension_numbers = #tpu.dot_dimension_numbers<[1], [0], [0], [1], [0, 0, 1, 1], [], []>} : vector<8x32xbf16>, vector<32x32xbf16>, vector<8x32xf32> -> vector<8x32xf32>
    %c0_11 = arith.constant 0 : index
    %c0_12 = arith.constant 0 : index
    %13 = vector.load %arg7[%c0_11, %c0_12] : memref<1x32xf32, #tpu.memory_space<vmem>>, vector<1x32xf32>
    %14 = vector.broadcast %13 : vector<1x32xf32> to vector<8x32xf32>
    %15 = arith.addf %12, %14 : vector<8x32xf32>
    %c0_13 = arith.constant 0 : index
    %c0_14 = arith.constant 0 : index
    %16 = vector.load %arg6[%c0_13, %c0_14] : memref<3x32xf32, #tpu.memory_space<vmem>>, vector<3x32xf32>
    %17 = vector.extract_strided_slice %9 {offsets = [0, 0], sizes = [8, 1], strides = [1, 1]} : vector<8x3xf32> to vector<8x1xf32>
    %18 = vector.extract_strided_slice %16 {offsets = [0, 0], sizes = [1, 32], strides = [1, 1]} : vector<3x32xf32> to vector<1x32xf32>
    %19 = vector.broadcast %17 : vector<8x1xf32> to vector<8x32xf32>
    %20 = vector.broadcast %18 : vector<1x32xf32> to vector<8x32xf32>
    %21 = arith.mulf %19, %20 : vector<8x32xf32>
    %22 = arith.addf %15, %21 : vector<8x32xf32>
    %23 = vector.extract_strided_slice %9 {offsets = [0, 1], sizes = [8, 1], strides = [1, 1]} : vector<8x3xf32> to vector<8x1xf32>
    %24 = vector.extract_strided_slice %16 {offsets = [1, 0], sizes = [1, 32], strides = [1, 1]} : vector<3x32xf32> to vector<1x32xf32>
    %25 = vector.broadcast %23 : vector<8x1xf32> to vector<8x32xf32>
    %26 = vector.broadcast %24 : vector<1x32xf32> to vector<8x32xf32>
    %27 = arith.mulf %25, %26 : vector<8x32xf32>
    %28 = arith.addf %22, %27 : vector<8x32xf32>
    %29 = vector.extract_strided_slice %9 {offsets = [0, 2], sizes = [8, 1], strides = [1, 1]} : vector<8x3xf32> to vector<8x1xf32>
    %30 = vector.extract_strided_slice %16 {offsets = [2, 0], sizes = [1, 32], strides = [1, 1]} : vector<3x32xf32> to vector<1x32xf32>
    %31 = vector.broadcast %29 : vector<8x1xf32> to vector<8x32xf32>
    %32 = vector.broadcast %30 : vector<1x32xf32> to vector<8x32xf32>
    %33 = arith.mulf %31, %32 : vector<8x32xf32>
    %34 = arith.addf %28, %33 : vector<8x32xf32>
    %35 = math.tanh %34 : vector<8x32xf32>
    %36 = math.exp %35 : vector<8x32xf32>
    %cst_15 = arith.constant dense<0.000000e+00> : vector<8xf32>
    %37 = vector.multi_reduction <add>, %36, %cst_15 [1] : vector<8x32xf32> to vector<8xf32>
    %38 = vector.shape_cast %37 : vector<8xf32> to vector<8x1xf32>
    %39 = tpu.reciprocal %38 {approx = true} : vector<8x1xf32> -> vector<8x1xf32>
    %40 = vector.broadcast %39 : vector<8x1xf32> to vector<8x32xf32>
    %41 = arith.mulf %36, %40 : vector<8x32xf32>
    %42 = arith.mulf %41, %0 : vector<8x32xf32>
    %c0_16 = arith.constant 0 : index
    %c0_17 = arith.constant 0 : index
    %43 = vector.load %arg8[%c0_16, %c0_17] : memref<8x32xf32, #tpu.memory_space<vmem>>, vector<8x32xf32>
    tpu.vector_store %arg8[%c0_16, %c0_17], %42 {strides = array<i32>} : memref<8x32xf32, #tpu.memory_space<vmem>>, vector<8x32xf32>,
    %c0_18 = arith.constant 0 : index
    %c0_19 = arith.constant 0 : index
    %44 = vector.load %arg9[%c0_18, %c0_19] : memref<8x32xf32, #tpu.memory_space<vmem>>, vector<8x32xf32>
    tpu.vector_store %arg9[%c0_18, %c0_19], %41 {strides = array<i32>} : memref<8x32xf32, #tpu.memory_space<vmem>>, vector<8x32xf32>,
    return
  }
  func.func @transform_0(%arg0: i32) -> (i32, i32) {
    %c0_i32 = arith.constant 0 : i32
    %c0_i32_0 = arith.constant 0 : i32
    return %arg0, %c0_i32 : i32, i32
  }
  func.func @transform_1(%arg0: i32) -> (i32, i32) {
    %c0_i32 = arith.constant 0 : i32
    %c0_i32_0 = arith.constant 0 : i32
    return %arg0, %c0_i32 : i32, i32
  }
  func.func @transform_2(%arg0: i32) -> (i32, i32) {
    %c0_i32 = arith.constant 0 : i32
    %c0_i32_0 = arith.constant 0 : i32
    %c0_i32_1 = arith.constant 0 : i32
    return %c0_i32, %c0_i32_0 : i32, i32
  }
  func.func @transform_3(%arg0: i32) -> (i32, i32) {
    %c0_i32 = arith.constant 0 : i32
    %c0_i32_0 = arith.constant 0 : i32
    %c0_i32_1 = arith.constant 0 : i32
    return %c0_i32, %c0_i32_0 : i32, i32
  }
  func.func @transform_4(%arg0: i32) -> (i32, i32) {
    %c0_i32 = arith.constant 0 : i32
    %c0_i32_0 = arith.constant 0 : i32
    %c0_i32_1 = arith.constant 0 : i32
    return %c0_i32, %c0_i32_0 : i32, i32
  }
  func.func @transform_5(%arg0: i32) -> (i32, i32) {
    %c0_i32 = arith.constant 0 : i32
    %c0_i32_0 = arith.constant 0 : i32
    %c0_i32_1 = arith.constant 0 : i32
    return %c0_i32, %c0_i32_0 : i32, i32
  }
  func.func @transform_6(%arg0: i32) -> (i32, i32) {
    %c0_i32 = arith.constant 0 : i32
    %c0_i32_0 = arith.constant 0 : i32
    %c0_i32_1 = arith.constant 0 : i32
    return %c0_i32, %c0_i32_0 : i32, i32
  }
  func.func @transform_7(%arg0: i32) -> (i32, i32) {
    %c0_i32 = arith.constant 0 : i32
    %c0_i32_0 = arith.constant 0 : i32
    return %arg0, %c0_i32 : i32, i32
  }
  func.func @transform_8(%arg0: i32) -> (i32, i32) {
    %c0_i32 = arith.constant 0 : i32
    %c0_i32_0 = arith.constant 0 : i32
    return %arg0, %c0_i32 : i32, i32
  }
}

</mosaic_0001>

<bundles_post_ra>
// kernel: tpu_custom_call.1
= control target key start
LH: loop header
LB: loop body
LE: loop exit
PB: predicated region body
PF: predicated region fallthrough
CT: control target
= control target key end

     0   :  { %14 = vsyncpa [#allocation3], 0  ;;  %s532_s0 = inlined_call_operand.vmem [shape: f32[8,16], index: 0, kind: input, shape index: {}]   ;;  %s533_s1 = inlined_call_operand.hbm [shape: f32[8,32], index: 1, kind: input, shape index: {}]   ;;  %s534_s2 = inlined_call_operand.vmem [shape: bf16[16,3], index: 2, kind: input, shape index: {}]   ;;  %s535_s3 = inlined_call_operand.hbm [shape: f32[1,3], index: 3, kind: input, shape index: {}]   ;;  %s536_s4 = inlined_call_operand.vmem [shape: bf16[32,32], index: 4, kind: input, shape index: {}]   ;;  %s537_s5 = inlined_call_operand.vmem [shape: f32[3,32], index: 5, kind: input, shape index: {}]   ;;  %s538_s6 = inlined_call_operand.vmem [shape: f32[1,32], index: 6, kind: input, shape index: {}]   ;;  %s539_s7 = inlined_call_operand.hbm [shape: f32[8,32], index: 7, kind: output, shape index: {0}]   ;;  %s540_s8 = inlined_call_operand.hbm [shape: f32[8,32], index: 8, kind: output, shape index: {1}]  }
   0x1   :  { %15 = vsyncpa [#allocation6], 0 }
   0x2   :  { %16 = vsyncpa [#allocation4], 0 }
   0x3   :  { %17 = vsyncpa [#allocation9], 0  ;;  %s403_s27 = smov [#allocation2]   ;;  %s404_s29 = smov [#allocation5]  }
   0x4   :  { %s26_s28 = sshll.u32 %s403_s27, 4  ;;  %s38_s30 = sshll.u32 %s404_s29, 4  ;;  %s27_s28 = int_to_ptr.vmem [resolvable:$true] %s26_s28  ;;  %s39_s30 = int_to_ptr.vmem [resolvable:$true] %s38_s30 }
   0x5   :  { %s307_s11 = scalar_lea.hbm %s533_s1, 128 }
   0x6   :  { %p308_p0 = scmp.ne.s32.totalorder %s533_s1, %s307_s11  ;;  %p311_p1 = scmp.lt.u32.totalorder %s307_s11, %s533_s1 }
   0x8   :  { %p313_p2 = pnand %p311_p1, %p308_p0 }
   0xa   :  { %316 = shalt.err (!%p313_p2)
}
   0xb   :  { %s317_s16 = scalar_lea.vmem %s27_s28, 128  ;;  %p322_p4 = scmp.lt.s32.totalorder %s27_s28, %s27_s28 }
   0xc   :  { %p318_p3 = scmp.ne.s32.totalorder %s27_s28, %s317_s16  ;;  %p323_p5 = scmp.lt.s32.totalorder %s317_s16, %s317_s16 }
   0xe   :  { %p324_p6 = por %p323_p5, %p322_p4 }
  0x10   :  { %p325_p7 = pnand %p324_p6, %p318_p3 }
  0x12   :  { %328 = shalt.err (!%p325_p7)
}
  0x13   :  { %29 = dma.hbm_to_vmem [thread:$0]  %s533_s1, 128, %s27_s28, [#allocation3]  }
  0x14   :  { %s329_s21 = scalar_lea.hbm %s535_s3, 16 }
  0x15   :  { %p330_p8 = scmp.ne.s32.totalorder %s535_s3, %s329_s21  ;;  %p333_p9 = scmp.lt.u32.totalorder %s329_s21, %s535_s3 }
  0x17   :  { %p335_p10 = pnand %p333_p9, %p330_p8 }
  0x19   :  { %338 = shalt.err (!%p335_p10)
}
  0x1a   :  { %s339_s26 = scalar_lea.vmem %s39_s30, 16  ;;  %s343_s27 = scalar_lea.vmem %s39_s30, 32 }
  0x1b   :  { %p340_p11 = scmp.ne.s32.totalorder %s39_s30, %s339_s26  ;;  %p344_p12 = scmp.lt.s32.totalorder %s39_s30, %s39_s30 }
  0x1c   :  { %p345_p13 = scmp.lt.s32.totalorder %s343_s27, %s339_s26 }
  0x1e   :  { %p346_p0 = por %p345_p13, %p344_p12 }
  0x20   :  { %p347_p1 = pnand %p346_p0, %p340_p11 }
  0x22   :  { %350 = shalt.err (!%p347_p1)
}
  0x23   :  { %41 = dma.hbm_to_vmem [thread:$0]  %s535_s3, 16, %s39_s30, [#allocation6]  }
  0x24   :  { %395 = dma.done.wait [#allocation3], 128  }
  0x25   :  { %396 = vsyncadd [#allocation3], 4294967168 }
  0x26   :  { %397 = dma.done.wait [#allocation6], 16  }
  0x27   :  { %398 = vsyncadd [#allocation6], 4294967280  ;;  %v405_v0 = vmov 0.0   ;;  %vm406_vm0 = vmmov 0   ;;  %v298_v1 = vld [vmem:[%s534_s2] sm:$0xff]   ;;  %vm73_vm1 = vcmask 130048   ;;  %v192_v22 = vlaneseq }
  0x28   :  { %271 = vmatprep.subr.bf16.mxu0 %v405_v0  ;;  %273 = vmatprep.mubr.msk.bf16.mxu0 %vm406_vm0, %v405_v0  ;;  %v56_v2 = vld [vmem:[%s532_s0] sm:$0xff]  ;;  %v300_v5 = vld [vmem:[%s536_s4 + $0x8] sm:$0xff]   ;;  %vm142_vm2 = vcmask 261120   ;;  %v407_v8 = vmov 2   ;;  %v408_v9 = vmov 0   ;;  %v409_v20 = vmov 1  }
  0x29   :  { %277 = vmatprep.subr.bf16.mxu1 %v405_v0  ;;  %281 = vmatprep.mubr.msk.bf16.mxu1 %vm406_vm0, %v405_v0  ;;  %v57_v3 = vpack.c.bf16 %v56_v2, %v56_v2  ;;  %v299_v4 = vld [vmem:[%s536_s4] sm:$0xff]   ;;  %v259_v10 = vld [vmem:[#allocation5] ss:$0 sm:$0xff]  ;;  %v193_v23 = vshrl.u32 %v192_v22, 7  ;;  %s411_s15 = smov [#allocation7]  }
  0x2a   :  { %272 = vmatpush3.bf16.msra.mxu0 %v298_v1  ;;  %278 = vmatpush3.bf16.msra.mxu1 %v299_v4  ;;  %v493_v6 = vld [vmem:[#allocation2] sm:$0xff]  ;;  %s235_s16 = sshll.u32 %s411_s15, 4  ;;  %s236_s16 = int_to_ptr.vmem [resolvable:$true] %s235_s16 }
  0x2b   :  { %279 = vmatprep.subr.bf16.mxu1 %v405_v0  ;;  %v118_v7 = vpack.c.bf16 %v493_v6, %v493_v6  ;;  %296 = vset.pattern.permute.xlu1 %v407_v8  ;;  %v194_v24 = vsub.s32 0, %v193_v23  ;;  %v186_v25 = vld [vmem:[%s537_s5] sm:$0x7]  ;;  %v204_v27 = vsub.s32 1, %v193_v23  ;;  %v214_v29 = vsub.s32 2, %v193_v23  ;;  %s410_s5 = smov [#allocation8]  }
  0x2c   :  { %294 = vset.pattern.permute.xlu0 %v408_v9  ;;  %v262_v28 = vld [vmem:[%s538_s6] ss:$0 sm:$0xff]  ;;  %s245_s6 = sshll.u32 %s410_s5, 4  ;;  %s246_s6 = int_to_ptr.vmem [resolvable:$true] %s245_s6 }
  0x2d   :  { %274 = vmatmul.mubr.msk.bf16.vlgmr.msra.gmra.mrb[0].mxu0 %vm73_vm1, %v57_v3  ;;  %v195_v26 = vrot.slane %v186_v25, %v194_v24  ;;  %v205_v33 = vrot.slane %v186_v25, %v204_v27  ;;  %v215_v34 = vrot.slane %v186_v25, %v214_v29  ;;  %s351_s17 = scalar_lea.vmem %s246_s6, 128  ;;  %p356_p3 = scmp.lt.s32.totalorder %s246_s6, %s246_s6 }
  0x2e   :  { %280 = vmatpush3.bf16.msra.mxu1 %v300_v5  ;;  %p352_p2 = scmp.ne.s32.totalorder %s246_s6, %s351_s17  ;;  %p357_p4 = scmp.lt.s32.totalorder %s351_s17, %s351_s17 }
  0x30   :  { %p358_p5 = por %p357_p4, %p356_p3 }
  0x31   :  { %282 = vmatmul.mubr.msk.bf16.vlgmr.msra.gmra.mrb[0].mxu1 %vm142_vm2, %v118_v7 }
  0x32   :  { %p359_p6 = pnand %p358_p5, %p352_p2 }
 0x100   :  { %v111_v11 = vpop.f32.mrb[0].mxu0 }
 0x101   :  { %v112_v12 = vadd.f32 %v259_v10, %v111_v11  ;;  %v275_v13 = vpop.f32.mrb[1].mxu0 }
 0x102   :  { %v114_v14 = vpop.f32.mrb[2].mxu0 }
 0x103   :  { %v117_v15 = vmax.f32 %v112_v12, 0.0  ;;  %v276_v16 = vpop.f32.mrb[3].mxu0 }
 0x104   :  { %v180_v17 = vpop.f32.mrb[0].mxu1 }
 0x105   :  { %209 = vperm.xlu1 %296, %v117_v15   ;;  %189 = vperm.xlu0 %294, %v117_v15   ;;  %v283_v18 = vpop.f32.mrb[1].mxu1  ;;  %v181_v32 = vadd.f32 %v262_v28, %v180_v17 }
 0x106   :  { %v183_v19 = vpop.f32.mrb[2].mxu1 }
 0x107   :  { %v284_v21 = vpop.f32.mrb[3].mxu1 }
 0x109   :  { %295 = vset.pattern.permute.xlu0 %v409_v20 }
 0x10a   :  { %199 = vperm.xlu0 %295, %v117_v15  }
 0x10e   :  { %297 = vset.pattern.permute.xlu0 %v407_v8 }
 0x184   :  { %v190_v30 = vpop.permute.xlu0 %189  ;;  %v210_v35 = vpop.permute.xlu1 %209 }
 0x185   :  { %v196_v31 = vmul.f32 %v195_v26, %v190_v30  ;;  %v216_v39 = vmul.f32 %v215_v34, %v210_v35 }
 0x187   :  { %v197_v37 = vadd.f32 %v196_v31, %v181_v32 }
 0x189   :  { %v200_v36 = vpop.permute.xlu0 %199 }
 0x18a   :  { %v206_v38 = vmul.f32 %v205_v33, %v200_v36 }
 0x18c   :  { %v207_v40 = vadd.f32 %v206_v38, %v197_v37 }
 0x18e   :  { %v217_v41 = vadd.f32 %v216_v39, %v207_v40 }
 0x190   :  { %301 = vtanh.f32 %v217_v41 }
 0x19a   :  { %v302_v42 = vpop.eup %301 }
 0x19b   :  { %v219_v43 = vmul.f32 1.442695, %v302_v42 }
 0x19d   :  { %303 = vpow2.f32 %v219_v43 }
 0x1a7   :  { %v304_v44 = vpop.eup %303 }
 0x1a8   :  { %v221_v45 = vsel %vm142_vm2, %v304_v44, 0.0 }
 0x1a9   :  { %222 = vadd.xlane.f32.xlu1 %v221_v45 }
 0x236   :  { %v223_v46 = vpop.xlane.xlu1 %222 }
 0x237   :  { %305 = vrcp.f32 %v223_v46 }
 0x241   :  { %v306_v47 = vpop.eup %305 }
 0x242   :  { %v225_v48 = vmul.f32 %v306_v47, %v304_v44 }
 0x244   :  { %v226_v49 = vmul.f32 %v225_v48, %v493_v6  ;;  %228 = vst.msk [vmem:[#allocation8] sm:$0xff] %vm142_vm2, %v225_v48 }
 0x245   :  { %362 = shalt.err (!%p359_p6)
}
 0x246   :  { %s363_s20 = scalar_lea.hbm %s540_s8, 128 }
 0x247   :  { %p364_p7 = scmp.ne.s32.totalorder %s540_s8, %s363_s20  ;;  %p367_p8 = scmp.lt.u32.totalorder %s363_s20, %s540_s8 }
 0x249   :  { %p369_p9 = pnand %p367_p8, %p364_p7 }
 0x24b   :  { %372 = shalt.err (!%p369_p9)
}
 0x24c   :  { %248 = dma.vmem_to_hbm [thread:$0]  %s246_s6, 128, %s540_s8, [#allocation9]   ;;  %227 = vst.msk [vmem:[#allocation7] sm:$0xff] %vm142_vm2, %v226_v49 }
 0x24d   :  { %s373_s27 = scalar_lea.vmem %s236_s16, 128  ;;  %p378_p11 = scmp.lt.s32.totalorder %s236_s16, %s236_s16 }
 0x24e   :  { %p374_p10 = scmp.ne.s32.totalorder %s236_s16, %s373_s27  ;;  %p379_p12 = scmp.lt.s32.totalorder %s373_s27, %s373_s27 }
 0x250   :  { %p380_p13 = por %p379_p12, %p378_p11 }
 0x252   :  { %p381_p0 = pnand %p380_p13, %p374_p10 }
 0x254   :  { %384 = shalt.err (!%p381_p0)
}
 0x255   :  { %s385_s29 = scalar_lea.hbm %s539_s7, 128 }
 0x256   :  { %p386_p1 = scmp.ne.s32.totalorder %s539_s7, %s385_s29  ;;  %p389_p2 = scmp.lt.u32.totalorder %s385_s29, %s539_s7 }
 0x258   :  { %p391_p3 = pnand %p389_p2, %p386_p1 }
 0x25a   :  { %394 = shalt.err (!%p391_p3)
}
 0x25b   :  { %238 = dma.vmem_to_hbm [thread:$0]  %s236_s16, 128, %s539_s7, [#allocation4]  }
 0x25c   :  { %399 = dma.done.wait [#allocation4], 128  }
 0x25d   :  { %400 = vsyncadd [#allocation4], 4294967168 }
 0x25e   :  { %401 = dma.done.wait [#allocation9], 128  }
 0x25f   :  { %402 = vsyncadd [#allocation9], 4294967168 }
 0x260   :  { %255 = vsyncpa [#allocation3], 1 }
 0x261   :  { %256 = vsyncpa [#allocation6], 1 }
 0x262   :  { %257 = vsyncpa [#allocation4], 1 }
 0x263   :  { %258 = vsyncpa [#allocation9], 1 }

</bundles_post_ra>
